<compile_context>
chip_gen: v7x
topology: tpu7x:2x2x1
jax: 0.10.0
libtpu: 0.0.40
codegen_flags: <defaults>
</compile_context>

<pallas_src>
import jax
import jax.numpy as jnp
from jax.experimental import pallas as pl
from jax.experimental.pallas import tpu as pltpu


# ----------------------------- helpers ------------------------------------- #

def _round_up(n, m):
    return ((n + m - 1) // m) * m


def _vmem_capacity_bytes():
    try:
        return int(pltpu.get_tpu_info().vmem_capacity_bytes)
    except Exception:
        return 64 * 1024 * 1024  # conservative default (v7x-sized)


_VMEM_CAP = _vmem_capacity_bytes()
# ~40 MiB on v7x (64 MiB physical), ~80 MiB on v5e/v6e (128 MiB physical);
# leaves headroom for compiler-internal scratch / spill.
_VMEM_LIMIT = min((_VMEM_CAP * 5) // 8, 100 * 1024 * 1024)
_BIG_VMEM = _VMEM_CAP >= 96 * 1024 * 1024   # v5e / v6e
_TK_MAX = 512                                # K tile for the Linear path


def _bspec(shape, index_map, buffers=None):
    """BlockSpec with optional reduced multi-buffering; falls back cleanly."""
    if buffers is not None:
        try:
            return pl.BlockSpec(shape, index_map,
                                pipeline_mode=pl.Buffered(buffers))
        except Exception:  # older jax without pipeline_mode / Buffered
            pass
    return pl.BlockSpec(shape, index_map)


def _pick_row_tile(n, dtype, tm_default):
    """Row tile: sublane-pack aligned, >=2 row tiles for medium/large N."""
    pack = 16 if dtype == jnp.bfloat16 else 8
    tm = min(tm_default, _round_up(max(n, 1), pack))
    n_pad = _round_up(n, tm)
    # v7x shards the "parallel" row axis across 2 TensorCores; make sure there
    # are at least 2 row tiles (cheap on single-TC chips: one extra grid step).
    if n_pad // tm == 1 and n > 16 * pack:
        tm = _round_up((n + 1) // 2, pack)
        n_pad = _round_up(n, tm)
    return tm, n_pad


# ----------------------------- kernels ------------------------------------- #

def _linear_kernel(x_ref, w_ref, b_ref, o_ref, acc_ref):
    k = pl.program_id(2)  # K (Din) tile index, inner "arbitrary" axis

    @pl.when(k == 0)
    def _init():
        acc_ref[...] = jnp.zeros_like(acc_ref)

    # MXU matmul with f32 accumulation; operands kept in their native dtype.
    acc_ref[...] += jnp.dot(x_ref[...], w_ref[...],
                            preferred_element_type=jnp.float32)

    @pl.when(k == pl.num_programs(2) - 1)
    def _finalize():
        o_ref[...] = (acc_ref[...] + b_ref[...]).astype(o_ref.dtype)


def _fc_kernel(x_ref, w1_ref, b1_ref, g_ref, bt_ref, w2_ref, b2_ref,
               o_ref, h_ref):
    j = pl.program_id(1)  # Dout-tile index (inner, "arbitrary")

    # Compute dense1 -> GELU -> LayerNorm once per row tile, cache in VMEM
    # (in w2's dtype so dense2 needs no per-iteration cast).
    @pl.when(j == 0)
    def _hidden():
        h = jnp.dot(x_ref[...], w1_ref[...],
                    preferred_element_type=jnp.float32) + b1_ref[...]
        # dropout(p=0.2) in eval mode == identity
        # exact GELU (torch.nn.GELU() default): 0.5*x*(1+erf(x/sqrt(2)))
        h = 0.5 * h * (1.0 + jax.lax.erf(h * jnp.float32(0.7071067811865476)))
        # LayerNorm over hidden dim (eps = 1e-5, elementwise affine)
        mean = jnp.mean(h, axis=-1, keepdims=True)
        var = jnp.mean(jnp.square(h - mean), axis=-1, keepdims=True)
        hn = (h - mean) * jax.lax.rsqrt(var + 1e-5)
        h_ref[...] = (hn * g_ref[...] + bt_ref[...]).astype(h_ref.dtype)

    # dense2 on the current Dout tile (bf16-in / f32-acc when weights are bf16).
    y = jnp.dot(h_ref[...], w2_ref[...],
                preferred_element_type=jnp.float32) + b2_ref[...]
    o_ref[...] = y.astype(o_ref.dtype)


# ----------------------------- param prep (once) --------------------------- #

def _prepare_linear(params, dtype, tn_default):
    """Pad/cast Linear weights once (not per forward)."""
    din, dout = params["w"].shape
    tn = min(tn_default, _round_up(max(dout, 1), 128))
    d_pad = _round_up(dout, tn)
    if din <= _TK_MAX:
        tk, kin_pad = din, din            # single K tile, no Din padding
    else:
        tk = _TK_MAX
        kin_pad = _round_up(din, tk)
    w = params["w"].astype(dtype)
    w = jnp.pad(w, ((0, kin_pad - din), (0, d_pad - dout)))
    b = jnp.pad(params["b"].astype(jnp.float32),
                (0, d_pad - dout)).reshape(1, d_pad)
    return dict(w=w, b=b, tn=tn, tk=tk, d_pad=d_pad, kin_pad=kin_pad,
                din=din, dout=dout)


def _prepare_fc(params, dtype, tn_default):
    """Pad/cast FC weights once (not per forward)."""
    din, h = params["w1"].shape
    dout = params["w2"].shape[1]
    tn = min(tn_default, _round_up(max(dout, 1), 128))
    d_pad = _round_up(dout, tn)
    w1 = params["w1"].astype(dtype)
    w2 = jnp.pad(params["w2"].astype(dtype), ((0, 0), (0, d_pad - dout)))
    b1 = params["b1"].astype(jnp.float32).reshape(1, h)
    g = params["gamma"].astype(jnp.float32).reshape(1, h)
    bt = params["beta"].astype(jnp.float32).reshape(1, h)
    b2 = jnp.pad(params["b2"].astype(jnp.float32),
                 (0, d_pad - dout)).reshape(1, d_pad)
    return dict(w1=w1, b1=b1, g=g, bt=bt, w2=w2, b2=b2,
                tn=tn, d_pad=d_pad, din=din, h=h, dout=dout)


# ----------------------------- wrappers ------------------------------------ #

def linear_forward(x, prep, *, tm_default=None):
    """x: (N, Din) -> (N, Dout) using pre-padded/pre-cast weights."""
    if tm_default is None:
        tm_default = 512 if _BIG_VMEM else 256
    N, din = x.shape
    dout, d_pad, tn = prep["dout"], prep["d_pad"], prep["tn"]
    tk, kin_pad = prep["tk"], prep["kin_pad"]

    tm, n_pad = _pick_row_tile(N, x.dtype, tm_default)
    xp = x
    if n_pad != N or kin_pad != din:
        xp = jnp.pad(x, ((0, n_pad - N), (0, kin_pad - din)))

    n_row_tiles = n_pad // tm
    n_col_tiles = d_pad // tn
    cost = pl.CostEstimate(
        flops=2 * n_pad * kin_pad * d_pad,
        transcendentals=0,
        bytes_accessed=int(xp.size * xp.dtype.itemsize * n_col_tiles
                           + prep["w"].size * prep["w"].dtype.itemsize * n_row_tiles
                           + prep["b"].size * 4
                           + n_pad * d_pad * x.dtype.itemsize))

    out = pl.pallas_call(
        _linear_kernel,
        out_shape=jax.ShapeDtypeStruct((n_pad, d_pad), x.dtype),
        grid_spec=pltpu.PrefetchScalarGridSpec(
            num_scalar_prefetch=0,
            grid=(n_row_tiles, n_col_tiles, kin_pad // tk),
            in_specs=[
                pl.BlockSpec((tm, tk), lambda i, j, k: (i, k)),
                pl.BlockSpec((tk, tn), lambda i, j, k: (k, j)),
                pl.BlockSpec((1, tn), lambda i, j, k: (0, j)),
            ],
            out_specs=pl.BlockSpec((tm, tn), lambda i, j, k: (i, j)),
            scratch_shapes=[pltpu.VMEM((tm, tn), jnp.float32)],
        ),
        compiler_params=pltpu.CompilerParams(
            dimension_semantics=("parallel", "parallel", "arbitrary"),
            vmem_limit_bytes=_VMEM_LIMIT),
        cost_estimate=cost,
    )(xp, prep["w"], prep["b"])
    return out[:N, :dout]


def fc_forward(x, prep, *, tm_default=256):
    """FullyConnectedLayer forward. x: (N, Din) -> (N, Dout)."""
    N, din = x.shape
    H, dout, d_pad, tn = prep["h"], prep["dout"], prep["d_pad"], prep["tn"]

    tm, n_pad = _pick_row_tile(N, x.dtype, tm_default)
    xp = jnp.pad(x, ((0, n_pad - N), (0, 0))) if n_pad != N else x

    h_dtype = prep["w2"].dtype  # bf16 hidden cache when running bf16
    n_row_tiles = n_pad // tm

    cost = pl.CostEstimate(
        flops=2 * n_pad * din * H + 2 * n_pad * H * d_pad + 10 * n_pad * H,
        transcendentals=n_pad * H,  # erf in GELU
        bytes_accessed=int(xp.size * xp.dtype.itemsize
                           + prep["w1"].size * prep["w1"].dtype.itemsize * n_row_tiles
                           + prep["w2"].size * prep["w2"].dtype.itemsize * n_row_tiles
                           + (prep["b1"].size + prep["g"].size
                              + prep["bt"].size + prep["b2"].size) * 4
                           + n_pad * d_pad * x.dtype.itemsize))

    out = pl.pallas_call(
        _fc_kernel,
        out_shape=jax.ShapeDtypeStruct((n_pad, d_pad), x.dtype),
        grid_spec=pltpu.PrefetchScalarGridSpec(
            num_scalar_prefetch=0,
            grid=(n_row_tiles, d_pad // tn),
            in_specs=[
                pl.BlockSpec((tm, din), lambda i, j: (i, 0)),
                # constant-index blocks: fetched once -> single buffer is free
                _bspec((din, H), lambda i, j: (0, 0), buffers=1),
                _bspec((1, H), lambda i, j: (0, 0), buffers=1),
                _bspec((1, H), lambda i, j: (0, 0), buffers=1),
                _bspec((1, H), lambda i, j: (0, 0), buffers=1),
                pl.BlockSpec((H, tn), lambda i, j: (0, j)),
                pl.BlockSpec((1, tn), lambda i, j: (0, j)),
            ],
            out_specs=pl.BlockSpec((tm, tn), lambda i, j: (i, j)),
            scratch_shapes=[pltpu.VMEM((tm, H), h_dtype)],
        ),
        compiler_params=pltpu.CompilerParams(
            # hidden scratch is carried across the Dout axis -> "arbitrary"
            dimension_semantics=("parallel", "arbitrary"),
            vmem_limit_bytes=_VMEM_LIMIT),
        cost_estimate=cost,
    )(xp, prep["w1"], prep["b1"], prep["g"], prep["bt"],
      prep["w2"], prep["b2"])
    return out[:N, :dout]


# ------------------------------ module ------------------------------------- #

class RepresentationLayer:
    """JAX/Pallas port of maverick RepresentationLayer ('Linear' and 'FC')."""

    def __init__(self, type, input_dim, output_dim, hidden_dim, *, key,
                 compute_dtype=jnp.float32):
        self.lt = type
        self.hidden_dim = hidden_dim
        self._tn_default = 512 if _BIG_VMEM else 256
        self._tm_default_linear = 512 if _BIG_VMEM else 256
        self._tm_default_fc = 256
        k = jax.random.split(key, 4)
        if type == "Linear":
            self.params = {
                "w": jax.random.normal(k[0], (input_dim, output_dim),
                                       jnp.float32) * 0.02,
                "b": jax.random.normal(k[1], (output_dim,),
                                       jnp.float32) * 0.02,
            }
        elif type == "FC":
            self.params = {
                "w1": jax.random.normal(k[0], (input_dim, hidden_dim),
                                        jnp.float32) * 0.02,
                "b1": jax.random.normal(k[1], (hidden_dim,),
                                        jnp.float32) * 0.02,
                "gamma": jnp.ones((hidden_dim,), jnp.float32),
                "beta": jnp.zeros((hidden_dim,), jnp.float32),
                "w2": jax.random.normal(k[2], (hidden_dim, output_dim),
                                        jnp.float32) * 0.02,
                "b2": jax.random.normal(k[3], (output_dim,),
                                        jnp.float32) * 0.02,
            }
        else:
            # TODO(synk): LSTM-left/right/bidirectional and Conv1d not ported.
            raise NotImplementedError(f"type {type!r} not supported")
        # Pre-pad / pre-cast weights ONCE; cached per compute dtype.
        self._prepared = {}
        self._get_prepared(compute_dtype)

    def _get_prepared(self, dtype):
        name = jnp.dtype(dtype).name
        if name not in self._prepared:
            if self.lt == "Linear":
                self._prepared[name] = _prepare_linear(
                    self.params, dtype, self._tn_default)
            else:
                self._prepared[name] = _prepare_fc(
                    self.params, dtype, self._tn_default)
        return self._prepared[name]

    def __call__(self, inputs):
        # inputs: (..., input_dim) -> flatten leading dims to N
        lead = inputs.shape[:-1]
        x = inputs.reshape(-1, inputs.shape[-1])
        prep = self._get_prepared(x.dtype)
        if self.lt == "Linear":
            y = linear_forward(x, prep, tm_default=self._tm_default_linear)
        else:  # FC
            y = fc_forward(x, prep, tm_default=self._tm_default_fc)
        return y.reshape(*lead, y.shape[-1])


# ------------------------------ reference ---------------------------------- #

def _fc_reference(x, p):
    h = x @ p["w1"] + p["b1"]
    h = jax.nn.gelu(h, approximate=False)
    mean = h.mean(-1, keepdims=True)
    var = ((h - mean) ** 2).mean(-1, keepdims=True)
    hn = (h - mean) / jnp.sqrt(var + 1e-5) * p["gamma"] + p["beta"]
    return hn @ p["w2"] + p["b2"]


if __name__ == "__main__":
    key = jax.random.PRNGKey(0)
    kx, kp1, kp2 = jax.random.split(key, 3)

    batch, seq = 2, 8
    input_dim, hidden_dim, output_dim = 32, 64, 32

    x = jax.random.normal(kx, (batch, seq, input_dim), jnp.float32)

    # FC path (FullyConnectedLayer)
    layer_fc = RepresentationLayer("FC", input_dim, output_dim, hidden_dim,
                                   key=kp1)
    out_fc = jax.block_until_ready(layer_fc(x))
    ref_fc = _fc_reference(x.reshape(-1, input_dim), layer_fc.params
                           ).reshape(batch, seq, output_dim)
    assert out_fc.shape == (batch, seq, output_dim)
    assert jnp.allclose(out_fc, ref_fc, atol=2e-4, rtol=2e-4)

    # Linear path
    layer_lin = RepresentationLayer("Linear", input_dim, output_dim,
                                    hidden_dim, key=kp2)
    out_lin = jax.block_until_ready(layer_lin(x))
    ref_lin = (x.reshape(-1, input_dim) @ layer_lin.params["w"]
               + layer_lin.params["b"]).reshape(batch, seq, output_dim)
    assert jnp.allclose(out_lin, ref_lin, atol=2e-4, rtol=2e-4)

    # Non-tile-aligned N (remainder rows) — exercises the padding path.
    x_odd = jax.random.normal(kx, (3, 7, input_dim), jnp.float32)
    out_odd = jax.block_until_ready(layer_fc(x_odd))
    ref_odd = _fc_reference(x_odd.reshape(-1, input_dim), layer_fc.params
                            ).reshape(3, 7, output_dim)
    assert jnp.allclose(out_odd, ref_odd, atol=2e-4, rtol=2e-4)

    # bf16 path (bf16-in / f32-acc, bf16 hidden cache) — exercises pre-cast
    # weight caching; loose tolerance vs the f32 reference.
    out_bf16 = jax.block_until_ready(layer_fc(x.astype(jnp.bfloat16)))
    assert out_bf16.dtype == jnp.bfloat16
    out_bf16_f32 = out_bf16.astype(jnp.float32)
    assert bool(jnp.all(jnp.isfinite(out_bf16_f32)))
    assert jnp.allclose(out_bf16_f32, ref_fc, atol=5e-2, rtol=5e-2)

    print("KERNEL_OK")
</pallas_src>

<mosaic_0001>
module attributes {stable_mosaic.version = 11 : i64} {
  func.func @_fc_kernel(%arg0: i32, %arg1: i32, %arg2: memref<16x32xf32, #tpu.memory_space<vmem>>, %arg3: memref<32x64xf32, #tpu.memory_space<vmem>>, %arg4: memref<1x64xf32, #tpu.memory_space<vmem>>, %arg5: memref<1x64xf32, #tpu.memory_space<vmem>>, %arg6: memref<1x64xf32, #tpu.memory_space<vmem>>, %arg7: memref<64x128xf32, #tpu.memory_space<vmem>>, %arg8: memref<1x128xf32, #tpu.memory_space<vmem>>, %arg9: memref<16x128xf32, #tpu.memory_space<vmem>>, %arg10: memref<16x64xf32, #tpu.memory_space<vmem>>) attributes {dimension_semantics = [#tpu.dimension_semantics<parallel>, #tpu.dimension_semantics<arbitrary>], iteration_bounds = array<i64: 1, 1>, scalar_prefetch = 0 : i64, scratch_operands = 1 : i64, tpu.core_type = #tpu.core_type<tc>, window_params = [{transform_indices = @transform_0, window_bounds = array<i64: 16, 32>}, {pipeline_mode = #tpu.pipeline_mode<synchronous>, transform_indices = @transform_1, window_bounds = array<i64: 32, 64>}, {pipeline_mode = #tpu.pipeline_mode<synchronous>, transform_indices = @transform_2, window_bounds = array<i64: 1, 64>}, {pipeline_mode = #tpu.pipeline_mode<synchronous>, transform_indices = @transform_3, window_bounds = array<i64: 1, 64>}, {pipeline_mode = #tpu.pipeline_mode<synchronous>, transform_indices = @transform_4, window_bounds = array<i64: 1, 64>}, {transform_indices = @transform_5, window_bounds = array<i64: 64, 128>}, {transform_indices = @transform_6, window_bounds = array<i64: 1, 128>}, {transform_indices = @transform_7, window_bounds = array<i64: 16, 128>}]} {
    %c0_i32 = arith.constant 0 : i32
    %0 = arith.cmpi eq, %arg1, %c0_i32 : i32
    %1 = arith.extui %0 : i1 to i32
    %c0_i32_0 = arith.constant 0 : i32
    %2 = arith.cmpi ne, %1, %c0_i32_0 : i32
    scf.if %2 {
      %c0_8 = arith.constant 0 : index
      %c0_9 = arith.constant 0 : index
      %10 = vector.load %arg2[%c0_8, %c0_9] : memref<16x32xf32, #tpu.memory_space<vmem>>, vector<16x32xf32>
      %c0_10 = arith.constant 0 : index
      %c0_11 = arith.constant 0 : index
      %11 = vector.load %arg3[%c0_10, %c0_11] : memref<32x64xf32, #tpu.memory_space<vmem>>, vector<32x64xf32>
      %cst_12 = arith.constant dense<0.000000e+00> : vector<16x64xf32>
      %12 = tpu.matmul %10, %11, %cst_12 {dimension_numbers = #tpu.dot_dimension_numbers<[1], [0], [0], [1], [0, 0, 1, 1], [], []>} : vector<16x32xf32>, vector<32x64xf32>, vector<16x64xf32> -> vector<16x64xf32>
      %c0_13 = arith.constant 0 : index
      %c0_14 = arith.constant 0 : index
      %13 = vector.load %arg4[%c0_13, %c0_14] : memref<1x64xf32, #tpu.memory_space<vmem>>, vector<1x64xf32>
      %14 = vector.broadcast %13 : vector<1x64xf32> to vector<16x64xf32>
      %15 = arith.addf %12, %14 : vector<16x64xf32>
      %cst_15 = arith.constant 5.000000e-01 : f32
      %16 = vector.broadcast %cst_15 : f32 to vector<16x64xf32>
      %17 = arith.mulf %16, %15 : vector<16x64xf32>
      %cst_16 = arith.constant 0.707106769 : f32
      %18 = vector.broadcast %cst_16 : f32 to vector<16x64xf32>
      %19 = arith.mulf %15, %18 : vector<16x64xf32>
      %20 = math.erf %19 : vector<16x64xf32>
      %cst_17 = arith.constant 1.000000e+00 : f32
      %21 = vector.broadcast %cst_17 : f32 to vector<16x64xf32>
      %22 = arith.addf %21, %20 : vector<16x64xf32>
      %23 = arith.mulf %17, %22 : vector<16x64xf32>
      %cst_18 = arith.constant dense<0.000000e+00> : vector<16xf32>
      %24 = vector.multi_reduction <add>, %23, %cst_18 [1] : vector<16x64xf32> to vector<16xf32>
      %25 = vector.shape_cast %24 : vector<16xf32> to vector<16x1xf32>
      %cst_19 = arith.constant 6.400000e+01 : f32
      %26 = vector.broadcast %cst_19 : f32 to vector<16x1xf32>
      %27 = arith.divf %25, %26 : vector<16x1xf32>
      %28 = vector.broadcast %27 : vector<16x1xf32> to vector<16x64xf32>
      %29 = arith.subf %23, %28 : vector<16x64xf32>
      %30 = arith.mulf %29, %29 : vector<16x64xf32>
      %cst_20 = arith.constant dense<0.000000e+00> : vector<16xf32>
      %31 = vector.multi_reduction <add>, %30, %cst_20 [1] : vector<16x64xf32> to vector<16xf32>
      %32 = vector.shape_cast %31 : vector<16xf32> to vector<16x1xf32>
      %cst_21 = arith.constant 6.400000e+01 : f32
      %33 = vector.broadcast %cst_21 : f32 to vector<16x1xf32>
      %34 = arith.divf %32, %33 : vector<16x1xf32>
      %35 = vector.broadcast %27 : vector<16x1xf32> to vector<16x64xf32>
      %36 = arith.subf %23, %35 : vector<16x64xf32>
      %cst_22 = arith.constant 9.99999974E-6 : f32
      %37 = vector.broadcast %cst_22 : f32 to vector<16x1xf32>
      %38 = arith.addf %34, %37 : vector<16x1xf32>
      %39 = math.rsqrt %38 : vector<16x1xf32>
      %40 = vector.broadcast %39 : vector<16x1xf32> to vector<16x64xf32>
      %41 = arith.mulf %36, %40 : vector<16x64xf32>
      %c0_23 = arith.constant 0 : index
      %c0_24 = arith.constant 0 : index
      %42 = vector.load %arg5[%c0_23, %c0_24] : memref<1x64xf32, #tpu.memory_space<vmem>>, vector<1x64xf32>
      %43 = vector.broadcast %42 : vector<1x64xf32> to vector<16x64xf32>
      %44 = arith.mulf %41, %43 : vector<16x64xf32>
      %c0_25 = arith.constant 0 : index
      %c0_26 = arith.constant 0 : index
      %45 = vector.load %arg6[%c0_25, %c0_26] : memref<1x64xf32, #tpu.memory_space<vmem>>, vector<1x64xf32>
      %46 = vector.broadcast %45 : vector<1x64xf32> to vector<16x64xf32>
      %47 = arith.addf %44, %46 : vector<16x64xf32>
      %c0_27 = arith.constant 0 : index
      %c0_28 = arith.constant 0 : index
      %48 = vector.load %arg10[%c0_27, %c0_28] : memref<16x64xf32, #tpu.memory_space<vmem>>, vector<16x64xf32>
      tpu.vector_store %arg10[%c0_27, %c0_28], %47 {strides = array<i32>} : memref<16x64xf32, #tpu.memory_space<vmem>>, vector<16x64xf32>,
    } else {
    }
    %c0 = arith.constant 0 : index
    %c0_1 = arith.constant 0 : index
    %3 = vector.load %arg10[%c0, %c0_1] : memref<16x64xf32, #tpu.memory_space<vmem>>, vector<16x64xf32>
    %c0_2 = arith.constant 0 : index
    %c0_3 = arith.constant 0 : index
    %4 = vector.load %arg7[%c0_2, %c0_3] : memref<64x128xf32, #tpu.memory_space<vmem>>, vector<64x128xf32>
    %cst = arith.constant dense<0.000000e+00> : vector<16x128xf32>
    %5 = tpu.matmul %3, %4, %cst {dimension_numbers = #tpu.dot_dimension_numbers<[1], [0], [0], [1], [0, 0, 1, 1], [], []>} : vector<16x64xf32>, vector<64x128xf32>, vector<16x128xf32> -> vector<16x128xf32>
    %c0_4 = arith.constant 0 : index
    %c0_5 = arith.constant 0 : index
    %6 = vector.load %arg8[%c0_4, %c0_5] : memref<1x128xf32, #tpu.memory_space<vmem>>, vector<1x128xf32>
    %7 = vector.broadcast %6 : vector<1x128xf32> to vector<16x128xf32>
    %8 = arith.addf %5, %7 : vector<16x128xf32>
    %c0_6 = arith.constant 0 : index
    %c0_7 = arith.constant 0 : index
    %9 = vector.load %arg9[%c0_6, %c0_7] : memref<16x128xf32, #tpu.memory_space<vmem>>, vector<16x128xf32>
    tpu.vector_store %arg9[%c0_6, %c0_7], %8 {strides = array<i32>} : memref<16x128xf32, #tpu.memory_space<vmem>>, vector<16x128xf32>,
    return
  }
  func.func @transform_0(%arg0: i32, %arg1: i32) -> (i32, i32) {
    %c0_i32 = arith.constant 0 : i32
    %c0_i32_0 = arith.constant 0 : i32
    return %arg0, %c0_i32 : i32, i32
  }
  func.func @transform_1(%arg0: i32, %arg1: i32) -> (i32, i32) {
    %c0_i32 = arith.constant 0 : i32
    %c0_i32_0 = arith.constant 0 : i32
    %c0_i32_1 = arith.constant 0 : i32
    return %c0_i32, %c0_i32_0 : i32, i32
  }
  func.func @transform_2(%arg0: i32, %arg1: i32) -> (i32, i32) {
    %c0_i32 = arith.constant 0 : i32
    %c0_i32_0 = arith.constant 0 : i32
    %c0_i32_1 = arith.constant 0 : i32
    return %c0_i32, %c0_i32_0 : i32, i32
  }
  func.func @transform_3(%arg0: i32, %arg1: i32) -> (i32, i32) {
    %c0_i32 = arith.constant 0 : i32
    %c0_i32_0 = arith.constant 0 : i32
    %c0_i32_1 = arith.constant 0 : i32
    return %c0_i32, %c0_i32_0 : i32, i32
  }
  func.func @transform_4(%arg0: i32, %arg1: i32) -> (i32, i32) {
    %c0_i32 = arith.constant 0 : i32
    %c0_i32_0 = arith.constant 0 : i32
    %c0_i32_1 = arith.constant 0 : i32
    return %c0_i32, %c0_i32_0 : i32, i32
  }
  func.func @transform_5(%arg0: i32, %arg1: i32) -> (i32, i32) {
    %c0_i32 = arith.constant 0 : i32
    %c0_i32_0 = arith.constant 0 : i32
    return %c0_i32, %arg1 : i32, i32
  }
  func.func @transform_6(%arg0: i32, %arg1: i32) -> (i32, i32) {
    %c0_i32 = arith.constant 0 : i32
    %c0_i32_0 = arith.constant 0 : i32
    return %c0_i32, %arg1 : i32, i32
  }
  func.func @transform_7(%arg0: i32, %arg1: i32) -> (i32, i32) {
    %c0_i32 = arith.constant 0 : i32
    return %arg0, %arg1 : i32, i32
  }
}

</mosaic_0001>

<bundles_post_ra>
// kernel: tpu_custom_call.1
= control target key start
LH: loop header
LB: loop body
LE: loop exit
PB: predicated region body
PF: predicated region fallthrough
CT: control target
= control target key end

     0   :  { %12 = vsyncpa [#allocation4], 0  ;;  %s663_s0 = inlined_call_operand.hbm [shape: f32[16,32], index: 0, kind: input, shape index: {}]   ;;  %s664_s1 = inlined_call_operand.hbm [shape: f32[32,64], index: 1, kind: input, shape index: {}]   ;;  %s665_s2 = inlined_call_operand.vmem [shape: f32[1,64], index: 2, kind: input, shape index: {}]   ;;  %s666_s3 = inlined_call_operand.vmem [shape: f32[1,64], index: 3, kind: input, shape index: {}]   ;;  %s667_s4 = inlined_call_operand.vmem [shape: f32[1,64], index: 4, kind: input, shape index: {}]   ;;  %s668_s5 = inlined_call_operand.hbm [shape: f32[64,128], index: 5, kind: input, shape index: {}]   ;;  %s669_s6 = inlined_call_operand.vmem [shape: f32[1,128], index: 6, kind: input, shape index: {}]   ;;  %s670_s7 = inlined_call_operand.hbm [shape: f32[16,128], index: 7, kind: output, shape index: {}]  }
   0x1   :  { %13 = vsyncpa [#allocation7], 0 }
   0x2   :  { %14 = vsyncpa [#allocation5], 0  ;;  %s530_s24 = smov [#allocation6]   ;;  %s531_s26 = smov [#allocation3]  }
   0x3   :  { %s32_s25 = sshll.u32 %s530_s24, 4  ;;  %s20_s27 = sshll.u32 %s531_s26, 4  ;;  %s33_s25 = int_to_ptr.vmem [resolvable:$true] %s32_s25  ;;  %s576_s27 = int_to_ptr.vmem [resolvable:$true] %s20_s27 }
   0x4   :  { %s436_s30 = scalar_lea.hbm %s664_s1, 512 }
   0x5   :  { %p437_p0 = scmp.ne.s32.totalorder %s664_s1, %s436_s30  ;;  %p440_p1 = scmp.lt.u32.totalorder %s436_s30, %s664_s1 }
   0x7   :  { %p442_p2 = pnand %p440_p1, %p437_p0 }
   0x9   :  { %445 = shalt.err (!%p442_p2)
}
   0xa   :  { %s446_s12 = scalar_lea.vmem %s33_s25, 512  ;;  %p451_p4 = scmp.lt.s32.totalorder %s33_s25, %s33_s25 }
   0xb   :  { %p447_p3 = scmp.ne.s32.totalorder %s33_s25, %s446_s12  ;;  %p452_p5 = scmp.lt.s32.totalorder %s446_s12, %s446_s12 }
   0xd   :  { %p453_p6 = por %p452_p5, %p451_p4 }
   0xf   :  { %p454_p7 = pnand %p453_p6, %p447_p3 }
  0x11   :  { %457 = shalt.err (!%p454_p7)
}
  0x12   :  { %s532_s13 = smov 128   ;;  %s533_s14 = smov 8  }
  0x13   :  { %38 = dma.hbm_to_vmem [thread:$0]  %s664_s1, 512, %s33_s25, [#allocation7], %s532_s13, %s532_s13, %s533_s14  }
  0x14   :  { %s458_s19 = scalar_lea.hbm %s663_s0, 256 }
  0x15   :  { %p459_p8 = scmp.ne.s32.totalorder %s663_s0, %s458_s19  ;;  %p462_p9 = scmp.lt.u32.totalorder %s458_s19, %s663_s0 }
  0x17   :  { %p464_p10 = pnand %p462_p9, %p459_p8 }
  0x19   :  { %467 = shalt.err (!%p464_p10)
}
  0x1a   :  { %s468_s24 = scalar_lea.vmem %s576_s27, 256  ;;  %p473_p12 = scmp.lt.s32.totalorder %s576_s27, %s576_s27 }
  0x1b   :  { %p469_p11 = scmp.ne.s32.totalorder %s576_s27, %s468_s24  ;;  %p474_p13 = scmp.lt.s32.totalorder %s468_s24, %s468_s24 }
  0x1d   :  { %p475_p0 = por %p474_p13, %p473_p12 }
  0x1f   :  { %p476_p1 = pnand %p475_p0, %p469_p11 }
  0x21   :  { %479 = shalt.err (!%p476_p1)
}
  0x22   :  { %26 = dma.hbm_to_vmem [thread:$0]  %s663_s0, 256, %s576_s27, [#allocation4], %s532_s13, %s532_s13, %s533_s14  }
  0x23   :  { %s534_s26 = smov [#allocation8]   ;;  %s480_s8 = scalar_lea.hbm %s668_s5, 1024 }
  0x24   :  { %s50_s28 = sshll.u32 %s534_s26, 4  ;;  %p481_p2 = scmp.ne.s32.totalorder %s668_s5, %s480_s8  ;;  %s51_s28 = int_to_ptr.vmem [resolvable:$true] %s50_s28 }
  0x25   :  { %p484_p3 = scmp.lt.u32.totalorder %s480_s8, %s668_s5 }
  0x27   :  { %p486_p4 = pnand %p484_p3, %p481_p2 }
  0x29   :  { %489 = shalt.err (!%p486_p4)
}
  0x2a   :  { %s490_s15 = scalar_lea.vmem %s51_s28, 1024  ;;  %p495_p6 = scmp.lt.s32.totalorder %s51_s28, %s51_s28 }
  0x2b   :  { %p491_p5 = scmp.ne.s32.totalorder %s51_s28, %s490_s15  ;;  %p496_p7 = scmp.lt.s32.totalorder %s490_s15, %s490_s15 }
  0x2d   :  { %p497_p8 = por %p496_p7, %p495_p6 }
  0x2f   :  { %p498_p9 = pnand %p497_p8, %p491_p5 }
  0x31   :  { %501 = shalt.err (!%p498_p9)
}
  0x32   :  { %56 = dma.hbm_to_vmem [thread:$0]  %s668_s5, 1024, %s51_s28, [#allocation7], %s532_s13, %s532_s13, %s533_s14  }
  0x33   :  { %524 = dma.done.wait [#allocation4], 256  }
  0x34   :  { %525 = vsyncadd [#allocation4], 4294967040 }
  0x35   :  { %526 = dma.done.wait [#allocation7], 1536  }
  0x36   :  { %527 = vsyncadd [#allocation7], 4294965760  ;;  %vm85_vm0 = vcmask 261120   ;;  %v74_v0 = vld [vmem:[#allocation6] sm:$0xff]  ;;  %v75_v1 = vld [vmem:[#allocation6 + $0x8] sm:$0xff]  ;;  %vm177_vm1 = vcmask 523264  }
  0x37   :  { %v76_v2 = vld [vmem:[#allocation6 + $0x10] sm:$0xff]  ;;  %v398_v3 = vpack.c.bf16 %v75_v1, %v74_v0  ;;  %v77_v4 = vld [vmem:[#allocation6 + $0x18] sm:$0xff]  ;;  %v344_v8 = vld [vmem:[%s665_s2] ss:$0 sm:$0xff] }
  0x38   :  { %v72_v5 = vld [vmem:[#allocation3] sm:$0xff]  ;;  %v402_v6 = vpack.c.bf16 %v77_v4, %v76_v2  ;;  %v73_v7 = vld [vmem:[#allocation3 + $0x8] sm:$0xff]  ;;  %v227_v35 = vld [vmem:[#allocation8] sm:$0xff] }
  0x39   :  { %376 = vmatprep.mubr.msk.f32.mxu0 %vm85_vm0, %v72_v5  ;;  %399 = vmatprep.subr.bf16.mxu0 %v398_v3  ;;  %v228_v36 = vld [vmem:[#allocation8 + $0x8] sm:$0xff]  ;;  %v229_v38 = vld [vmem:[#allocation8 + $0x10] sm:$0xff]  ;;  %v230_v39 = vld [vmem:[#allocation8 + $0x18] sm:$0xff] }
  0x3a   :  { %401 = vmatpush3.bf16.msra.mxu0 %v398_v3  ;;  %v406_v37 = vpack.c.bf16 %v228_v36, %v227_v35  ;;  %v410_v40 = vpack.c.bf16 %v230_v39, %v229_v38  ;;  %v231_v41 = vld [vmem:[#allocation8 + $0x20] sm:$0xff]  ;;  %v232_v42 = vld [vmem:[#allocation8 + $0x28] sm:$0xff]  ;;  %v233_v44 = vld [vmem:[#allocation8 + $0x30] sm:$0xff] }
  0x3b   :  { %403 = vmatprep.subr.bf16.mxu0 %v402_v6  ;;  %v414_v43 = vpack.c.bf16 %v232_v42, %v231_v41  ;;  %v234_v45 = vld [vmem:[#allocation8 + $0x38] sm:$0xff]  ;;  %v347_v54 = vld [vmem:[%s666_s3] ss:$0 sm:$0xff] }
  0x3c   :  { %407 = vmatprep.subr.bf16.mxu1 %v406_v37  ;;  %v418_v46 = vpack.c.bf16 %v234_v45, %v233_v44  ;;  %v348_v56 = vld [vmem:[%s667_s4] ss:$0 sm:$0xff]  ;;  %s535_s4 = smov [#allocation9]  }
  0x3d   :  { %409 = vmatpush3.bf16.msra.mxu1 %v406_v37  ;;  %v349_v1 = vld [vmem:[%s669_s6] ss:$0 sm:$0xff]  ;;  %s331_s21 = sshll.u32 %s535_s4, 4  ;;  %s332_s21 = int_to_ptr.vmem [resolvable:$true] %s331_s21 }
  0x3e   :  { %405 = vmatpush3.bf16.msra.mxu0 %v402_v6  ;;  %411 = vmatprep.subr.bf16.mxu1 %v410_v40  ;;  %s502_s22 = scalar_lea.vmem %s332_s21, 256  ;;  %p507_p11 = scmp.lt.s32.totalorder %s332_s21, %s332_s21 }
  0x3f   :  { %p503_p10 = scmp.ne.s32.totalorder %s332_s21, %s502_s22  ;;  %p508_p12 = scmp.lt.s32.totalorder %s502_s22, %s502_s22 }
  0x41   :  { %377 = vmatmul.mubr.msk.f32.vlgmr.msra.gmra.mrb[0].mxu0 %vm85_vm0, %v73_v7  ;;  %413 = vmatpush3.bf16.msra.mxu1 %v410_v40  ;;  %p509_p13 = por %p508_p12, %p507_p11 }
  0x42   :  { %415 = vmatprep.subr.bf16.mxu1 %v414_v43 }
  0x43   :  { %p510_p0 = pnand %p509_p13, %p503_p10 }
  0x45   :  { %417 = vmatpush3.bf16.msra.mxu1 %v414_v43 }
  0x46   :  { %419 = vmatprep.subr.bf16.mxu1 %v418_v46 }
  0x49   :  { %421 = vmatpush3.bf16.msra.mxu1 %v418_v46 }
 0x114   :  { %v378_v9 = vpop.f32.mrb[0].mxu0 }
 0x115   :  { %v164_v10 = vadd.f32 %v378_v9, %v344_v8  ;;  %v158_v11 = vpop.f32.mrb[1].mxu0 }
 0x116   :  { %v159_v12 = vadd.f32 %v344_v8, %v158_v11 }
 0x117   :  { %v170_v13 = vmul.f32 0.70710677, %v164_v10  ;;  %v168_v20 = vmul.f32 0.5, %v164_v10 }
 0x118   :  { %v169_v14 = vmul.f32 0.70710677, %v159_v12  ;;  %v167_v17 = vmul.f32 0.5, %v159_v12 }
 0x119   :  { %428 = verf.f32 %v170_v13 }
 0x11a   :  { %430 = verf.f32 %v169_v14 }
 0x123   :  { %v429_v15 = vpop.eup %428 }
 0x124   :  { %v431_v16 = vpop.eup %430  ;;  %v174_v19 = vadd.f32 1.0, %v429_v15 }
 0x125   :  { %v173_v18 = vadd.f32 1.0, %v431_v16 }
 0x126   :  { %v176_v23 = vmul.f32 %v174_v19, %v168_v20 }
 0x127   :  { %v175_v21 = vmul.f32 %v173_v18, %v167_v17 }
 0x128   :  { %v181_v24 = vsel %vm177_vm1, %v176_v23, 0.0 }
 0x129   :  { %v178_v22 = vsel %vm177_vm1, %v175_v21, 0.0 }
 0x12a   :  { %179 = vadd.xlane.f32.xlu0 %v178_v22 }
 0x12e   :  { %182 = vadd.xlane.f32.xlu0 %v181_v24 }
 0x1b7   :  { %v180_v25 = vpop.xlane.xlu0 %179 }
 0x1b8   :  { %v185_v26 = vmul.f32 0.015625, %v180_v25 }
 0x1ba   :  { %v187_v27 = vsub.f32 %v175_v21, %v185_v26 }
 0x1bb   :  { %v183_v28 = vpop.xlane.xlu0 %182 }
 0x1bc   :  { %v186_v29 = vmul.f32 0.015625, %v183_v28  ;;  %v189_v30 = vmul.f32 %v187_v27, %v187_v27 }
 0x1be   :  { %v188_v31 = vsub.f32 %v176_v23, %v186_v29  ;;  %v191_v32 = vsel %vm177_vm1, %v189_v30, 0.0 }
 0x1bf   :  { %192 = vadd.xlane.f32.xlu1 %v191_v32 }
 0x1c0   :  { %v190_v33 = vmul.f32 %v188_v31, %v188_v31 }
 0x1c2   :  { %v194_v34 = vsel %vm177_vm1, %v190_v33, 0.0 }
 0x1c3   :  { %195 = vadd.xlane.f32.xlu1 %v194_v34 }
 0x24c   :  { %v193_v47 = vpop.xlane.xlu1 %192 }
 0x24d   :  { %v197_v48 = vmul.f32 0.015625, %v193_v47 }
 0x24f   :  { %v199_v49 = vadd.f32 1e-05, %v197_v48 }
 0x250   :  { %v196_v50 = vpop.xlane.xlu1 %195 }
 0x251   :  { %432 = vrsqrt.f32 %v199_v49  ;;  %v198_v51 = vmul.f32 0.015625, %v196_v50 }
 0x253   :  { %v200_v52 = vadd.f32 1e-05, %v198_v51 }
 0x255   :  { %434 = vrsqrt.f32 %v200_v52 }
 0x25b   :  { %v433_v53 = vpop.eup %432 }
 0x25c   :  { %v203_v55 = vmul.f32 %v433_v53, %v187_v27 }
 0x25e   :  { %v212_v57 = vmul.f32 %v347_v54, %v203_v55 }
 0x25f   :  { %v435_v58 = vpop.eup %434 }
 0x260   :  { %v221_v59 = vadd.f32 %v348_v56, %v212_v57  ;;  %v204_v60 = vmul.f32 %v435_v58, %v188_v31 }
 0x262   :  { %223 = vst.msk [vmem:[#allocation2] sm:$0xff] %vm177_vm1, %v221_v59  ;;  %v213_v61 = vmul.f32 %v347_v54, %v204_v60 }
 0x264   :  { %v222_v62 = vadd.f32 %v348_v56, %v213_v61 }
 0x266   :  { %224 = vst.msk [vmem:[#allocation2 + $0x8] sm:$0xff] %vm177_vm1, %v222_v62 }
 0x269   :  { %v225_v63 = vld [vmem:[#allocation2] sm:$0xff] }
 0x26a   :  { %395 = vmatprep.mubr.msk.f32.mxu1 %vm177_vm1, %v225_v63 }
 0x26d   :  { %v226_v0 = vld [vmem:[#allocation2 + $0x8] sm:$0xff] }
 0x26e   :  { %396 = vmatmul.mubr.msk.f32.vlgmr.msra.gmra.mrb[0].mxu1 %vm177_vm1, %v226_v0 }
 0x341   :  { %v397_v2 = vpop.f32.mrb[0].mxu1 }
 0x342   :  { %v321_v3 = vadd.f32 %v397_v2, %v349_v1  ;;  %v315_v4 = vpop.f32.mrb[1].mxu1 }
 0x343   :  { %v316_v5 = vadd.f32 %v349_v1, %v315_v4 }
 0x344   :  { %325 = vst [vmem:[#allocation9 + $0x8] sm:$0xff] %v321_v3 }
 0x345   :  { %324 = vst [vmem:[#allocation9] sm:$0xff] %v316_v5 }
 0x346   :  { %513 = shalt.err (!%p510_p0)
}
 0x347   :  { %s514_s6 = scalar_lea.hbm %s670_s7, 256 }
 0x348   :  { %p515_p1 = scmp.ne.s32.totalorder %s670_s7, %s514_s6  ;;  %p518_p2 = scmp.lt.u32.totalorder %s514_s6, %s670_s7 }
 0x34a   :  { %p520_p3 = pnand %p518_p2, %p515_p1 }
 0x34c   :  { %523 = shalt.err (!%p520_p3)
}
 0x34d   :  { %337 = dma.vmem_to_hbm [thread:$0]  %s332_s21, 256, %s670_s7, [#allocation5], %s532_s13, %s532_s13, %s533_s14  }
 0x34e   :  { %528 = dma.done.wait [#allocation5], 256  }
 0x34f   :  { %529 = vsyncadd [#allocation5], 4294967040 }
 0x350   :  { %341 = vsyncpa [#allocation4], 1 }
 0x351   :  { %342 = vsyncpa [#allocation7], 1 }
 0x352   :  { %343 = vsyncpa [#allocation5], 1 }

</bundles_post_ra>
